<compile_context>
chip_gen: v7x
topology: tpu7x:2x2x1
jax: 0.10.0
libtpu: 0.0.40
codegen_flags: <defaults>
</compile_context>

<pallas_src>
import jax
import jax.numpy as jnp
from jax import lax
from jax.experimental import pallas as pl
from jax.experimental.pallas import tpu as pltpu

_VMEM_LIMIT = 40 * 1024 * 1024


# ---------------------------- Pallas kernels ----------------------------

def conv_relu_pool_kernel(p_ref, w_ref, b_ref, o_ref):
    """Fused conv(3x3, s=1, p=1) + bias + ReLU + 2x2/2 max-pool as ONE GEMM.

    p_ref: (1, 4, QB, pack*K)   im2col patches; axis 1 = the four pool phases,
                                each row packs `pack` pooled pixels
    w_ref: (pack*K, 128)        block-diagonal conv weight (bf16)
    b_ref: (1, 128)             bias tiled `pack` times (f32)
    o_ref: (1, QB, 128)         pooled output (spatial-major, channel-minor)
    """
    qb = p_ref.shape[2]
    kp = p_ref.shape[3]
    p = p_ref[0].reshape(4 * qb, kp)                    # leading-dim merge only
    y = jnp.dot(p, w_ref[...], preferred_element_type=jnp.float32)
    y = jnp.max(y.reshape(4, qb, y.shape[-1]), axis=0)  # 2x2/2 max-pool
    o_ref[0] = jnp.maximum(y + b_ref[...], 0.0).astype(o_ref.dtype)


def mlp_kernel(x_ref, w1_ref, b1_ref, w2_ref, b2_ref, o_ref, acc_ref):
    """K-tiled fc1 (contraction on F, lane-dense (64, kt) weight blocks) with a
    bias-initialized f32 accumulator; ReLU + fc2 + bias on the last K step."""
    @pl.when(pl.program_id(0) == 0)
    def _():
        acc_ref[...] = jnp.broadcast_to(b1_ref[...], acc_ref.shape)

    # (N, kt) . (64, kt)^T  ->  (N, 64), contracting on the F axis of both.
    acc_ref[...] += lax.dot_general(
        x_ref[...], w1_ref[...],
        dimension_numbers=(((1,), (1,)), ((), ())),
        preferred_element_type=jnp.float32)

    @pl.when(pl.program_id(0) == pl.num_programs(0) - 1)
    def _():
        h = jnp.maximum(acc_ref[...], 0.0).astype(w2_ref.dtype)
        y = jnp.dot(h, w2_ref[...], preferred_element_type=jnp.float32)
        o_ref[...] = (y + b2_ref[...]).astype(o_ref.dtype)


# ------------------------------ helpers ---------------------------------

def _round_up(x, m):
    return ((x + m - 1) // m) * m


def _pick_pack(q, cout):
    """Smallest divisor of q with pack*cout >= 128 (lane-dense output)."""
    best = 1
    for p in (1, 2, 4, 8, 16):
        if q % p == 0:
            best = p
            if p * cout >= 128:
                return p
    return best


def _pick_qb(qp):
    """8-aligned Q-slab rows per step: aim for ~4 slabs per image (pipeline
    depth / v7x megacore), cap 256 rows; full dim for tiny qp."""
    if qp <= 8:
        return qp
    return min(_round_up(pl.cdiv(qp, 4), 8), 256)


def _largest_aligned_divisor(total, align, cap):
    """Largest divisor of `total` that is a multiple of `align` and <= cap;
    falls back to `total` (exact divisor keeps the K reduction garbage-free)."""
    best = None
    d = align
    while d <= min(cap, total):
        if total % d == 0:
            best = d
        d += align
    return best if best is not None else total


def _im2col_pool_phases(xp, hh, wh):
    """xp: (N, H+2, W+2, Cin) zero-padded NHWC input.
    Returns (N, 4, hh*wh, 9*Cin); phase = 2*py + px, columns (dy, dx, cin)."""
    n, _, _, cin = xp.shape
    blocks = []
    for py in range(2):
        for px in range(2):
            feats = []
            for dy in range(3):
                for dx in range(3):
                    sl = xp[:, py + dy::2, px + dx::2, :][:, :hh, :wh, :]
                    feats.append(sl.reshape(n, hh * wh, cin))
            blocks.append(jnp.concatenate(feats, axis=-1))
    return jnp.stack(blocks, axis=1)


# ------------------------------- wrappers --------------------------------

def conv_relu_pool(x_nhwc, wbd, bias_p, hh, wh):
    """x_nhwc: (N, H, W, Cin) bf16 -> pooled (N, q//pack, pack*Cout) bf16."""
    n, _, _, cin = x_nhwc.shape
    kp, cop = wbd.shape                       # pack*9*cin, pack*cout (== 128)
    pack = kp // (9 * cin)
    q = hh * wh
    assert q % pack == 0
    qp = q // pack

    xp = jnp.pad(x_nhwc, ((0, 0), (1, 1), (1, 1), (0, 0)))
    patches = _im2col_pool_phases(xp, hh, wh).reshape(n, 4, qp, kp)

    qb = _pick_qb(qp)
    grid = (n, pl.cdiv(qp, qb))
    return pl.pallas_call(
        conv_relu_pool_kernel,
        out_shape=jax.ShapeDtypeStruct((n, qp, cop), jnp.bfloat16),
        grid=grid,
        in_specs=[
            pl.BlockSpec((1, 4, qb, kp), lambda i, j: (i, 0, j, 0)),
            pl.BlockSpec((kp, cop), lambda i, j: (0, 0)),
            pl.BlockSpec((1, cop), lambda i, j: (0, 0)),
        ],
        out_specs=pl.BlockSpec((1, qb, cop), lambda i, j: (i, j, 0)),
        compiler_params=pltpu.CompilerParams(
            dimension_semantics=("parallel", "parallel"),
            vmem_limit_bytes=_VMEM_LIMIT),
    )(patches, wbd, bias_p)


def mlp(feats, w1, b1, w2t, b2):
    """feats: (N, F) bf16; w1: (64, F) bf16 (NHWC cols); w2t: (64, C) bf16."""
    n, f = feats.shape
    hid = w1.shape[0]
    nc = w2t.shape[1]
    kt = _largest_aligned_divisor(f, 128, min(max(f // 2, 128), 8192))
    grid = (f // kt,)
    return pl.pallas_call(
        mlp_kernel,
        out_shape=jax.ShapeDtypeStruct((n, nc), jnp.float32),
        grid=grid,
        in_specs=[
            pl.BlockSpec((n, kt), lambda k: (0, k)),
            pl.BlockSpec((hid, kt), lambda k: (0, k)),   # lane-dense weight block
            pl.BlockSpec((1, hid), lambda k: (0, 0)),
            pl.BlockSpec((hid, nc), lambda k: (0, 0)),
            pl.BlockSpec((1, nc), lambda k: (0, 0)),
        ],
        out_specs=pl.BlockSpec((n, nc), lambda k: (0, 0)),
        scratch_shapes=[pltpu.VMEM((n, hid), jnp.float32)],
        compiler_params=pltpu.CompilerParams(
            dimension_semantics=("arbitrary",),
            vmem_limit_bytes=_VMEM_LIMIT),
    )(feats, w1, b1, w2t, b2)


def serina_forward(x_nchw, prepped):
    n, _, h, w = x_nchw.shape
    x = jnp.transpose(x_nchw, (0, 2, 3, 1)).astype(jnp.bfloat16)   # NCHW -> NHWC
    hh1, wh1 = h // 2, w // 2
    hh2, wh2 = h // 4, w // 4
    # conv1 + relu + pool  -> (n, q1/8, 128), NHWC element order
    x = conv_relu_pool(x, prepped["conv1_w"], prepped["conv1_b"], hh1, wh1)
    x = x.reshape(n, hh1, wh1, -1)
    # conv2 + relu + pool  -> (n, q2/4, 128), NHWC element order
    x = conv_relu_pool(x, prepped["conv2_w"], prepped["conv2_b"], hh2, wh2)
    feats = x.reshape(n, -1)          # NHWC-flattened; fc1 columns permuted
                                      # at prep time to match.
    return mlp(feats, prepped["fc1_w"], prepped["fc1_b"],
               prepped["fc2_w"], prepped["fc2_b"])


# ------------------------- one-time param packing -------------------------

def _pack_conv(w_oihw, b, q):
    cout, cin = w_oihw.shape[0], w_oihw.shape[1]
    pack = _pick_pack(q, cout)                 # pack*cout == 128 (conv1: 8, conv2: 4)
    wmat = jnp.transpose(w_oihw, (2, 3, 1, 0)).reshape(9 * cin, cout)
    wbd = jnp.kron(jnp.eye(pack, dtype=wmat.dtype), wmat).astype(jnp.bfloat16)
    bias = jnp.tile(b, pack).reshape(1, pack * cout).astype(jnp.float32)
    return wbd, bias


def prepare_params(params, h, w):
    """One-time layout plumbing: block-diag conv weights (lane-dense output),
    NCHW->NHWC column permutation of fc1 (kept in native (64, F) layout),
    bf16 streaming operands."""
    hh2, wh2 = h // 4, w // 4
    c2 = params["conv2_w"].shape[0]
    w1 = params["fc1_w"]                      # (64, F), NCHW-flatten column order
    f = w1.shape[1]
    assert f == c2 * hh2 * wh2, "fc1 in-features must equal 32*(H/4)*(W/4)"
    w1p = (w1.reshape(-1, c2, hh2, wh2).transpose(0, 2, 3, 1).reshape(-1, f)
           ).astype(jnp.bfloat16)              # (64, F), NHWC column order
    cw1, cb1 = _pack_conv(params["conv1_w"], params["conv1_b"], (h // 2) * (w // 2))
    cw2, cb2 = _pack_conv(params["conv2_w"], params["conv2_b"], hh2 * wh2)
    return {
        "conv1_w": cw1, "conv1_b": cb1,
        "conv2_w": cw2, "conv2_b": cb2,
        "fc1_w": w1p,
        "fc1_b": params["fc1_b"].reshape(1, -1).astype(jnp.float32),
        "fc2_w": params["fc2_w"].T.astype(jnp.bfloat16),
        "fc2_b": params["fc2_b"].reshape(1, -1).astype(jnp.float32),
    }


def init_params(key, h, w, num_classes):
    f = 32 * (h // 4) * (w // 4)     # fc1 in-features (2048 for the 32x32 demo)
    ks = jax.random.split(key, 8)
    return {
        "conv1_w": jax.random.normal(ks[0], (16, 1, 3, 3), jnp.float32) * 0.10,
        "conv1_b": jax.random.normal(ks[1], (16,), jnp.float32) * 0.10,
        "conv2_w": jax.random.normal(ks[2], (32, 16, 3, 3), jnp.float32) * 0.05,
        "conv2_b": jax.random.normal(ks[3], (32,), jnp.float32) * 0.05,
        "fc1_w":   jax.random.normal(ks[4], (64, f), jnp.float32) * 0.02,
        "fc1_b":   jax.random.normal(ks[5], (64,), jnp.float32) * 0.02,
        "fc2_w":   jax.random.normal(ks[6], (num_classes, 64), jnp.float32) * 0.10,
        "fc2_b":   jax.random.normal(ks[7], (num_classes,), jnp.float32) * 0.10,
    }


if __name__ == "__main__":
    N, H, W, NUM_CLASSES = 2, 32, 32, 10
    key = jax.random.PRNGKey(0)
    k_x, k_p = jax.random.split(key)
    x = jax.random.normal(k_x, (N, 1, H, W), jnp.float32)        # NCHW, 1 channel
    params = init_params(k_p, H, W, NUM_CLASSES)
    prepped = prepare_params(params, H, W)

    forward = jax.jit(serina_forward)
    logits = jax.block_until_ready(forward(x, prepped))
    assert logits.shape == (N, NUM_CLASSES) and logits.dtype == jnp.float32
    print("KERNEL_OK")
</pallas_src>

<mosaic_0001>
module attributes {stable_mosaic.version = 11 : i64} {
  func.func @conv_relu_pool_kernel(%arg0: i32, %arg1: i32, %arg2: memref<1x4x8x72xbf16, #tpu.memory_space<vmem>>, %arg3: memref<72x128xbf16, #tpu.memory_space<vmem>>, %arg4: memref<1x128xf32, #tpu.memory_space<vmem>>, %arg5: memref<1x8x128xbf16, #tpu.memory_space<vmem>>) attributes {dimension_semantics = [#tpu.dimension_semantics<parallel>, #tpu.dimension_semantics<parallel>], iteration_bounds = array<i64: 2, 4>, scalar_prefetch = 0 : i64, scratch_operands = 0 : i64, tpu.core_type = #tpu.core_type<tc>, window_params = [{transform_indices = @transform_0, window_bounds = array<i64: 1, 4, 8, 72>}, {pipeline_mode = #tpu.pipeline_mode<synchronous>, transform_indices = @transform_1, window_bounds = array<i64: 72, 128>}, {pipeline_mode = #tpu.pipeline_mode<synchronous>, transform_indices = @transform_2, window_bounds = array<i64: 1, 128>}, {transform_indices = @transform_3, window_bounds = array<i64: 1, 8, 128>}]} {
    %c0 = arith.constant 0 : index
    %c0_0 = arith.constant 0 : index
    %c0_1 = arith.constant 0 : index
    %c0_2 = arith.constant 0 : index
    %0 = vector.load %arg2[%c0, %c0_0, %c0_1, %c0_2] : memref<1x4x8x72xbf16, #tpu.memory_space<vmem>>, vector<1x4x8x72xbf16>
    %1 = vector.shape_cast %0 : vector<1x4x8x72xbf16> to vector<4x8x72xbf16>
    %2 = vector.shape_cast %1 : vector<4x8x72xbf16> to vector<32x72xbf16>
    %c0_3 = arith.constant 0 : index
    %c0_4 = arith.constant 0 : index
    %3 = vector.load %arg3[%c0_3, %c0_4] : memref<72x128xbf16, #tpu.memory_space<vmem>>, vector<72x128xbf16>
    %cst = arith.constant dense<0.000000e+00> : vector<32x128xf32>
    %4 = tpu.matmul %2, %3, %cst {dimension_numbers = #tpu.dot_dimension_numbers<[1], [0], [0], [1], [0, 0, 1, 1], [], []>} : vector<32x72xbf16>, vector<72x128xbf16>, vector<32x128xf32> -> vector<32x128xf32>
    %5 = vector.shape_cast %4 : vector<32x128xf32> to vector<4x8x128xf32>
    %cst_5 = arith.constant dense<0xFF800000> : vector<8x128xf32>
    %6 = vector.multi_reduction <maximumf>, %5, %cst_5 [0] : vector<4x8x128xf32> to vector<8x128xf32>
    %c0_6 = arith.constant 0 : index
    %c0_7 = arith.constant 0 : index
    %7 = vector.load %arg4[%c0_6, %c0_7] : memref<1x128xf32, #tpu.memory_space<vmem>>, vector<1x128xf32>
    %8 = vector.broadcast %7 : vector<1x128xf32> to vector<8x128xf32>
    %9 = arith.addf %6, %8 : vector<8x128xf32>
    %cst_8 = arith.constant 0.000000e+00 : f32
    %10 = vector.broadcast %cst_8 : f32 to vector<8x128xf32>
    %11 = arith.maximumf %9, %10 : vector<8x128xf32>
    %12 = arith.truncf %11 : vector<8x128xf32> to vector<8x128xbf16>
    %c0_9 = arith.constant 0 : index
    %c0_10 = arith.constant 0 : index
    %c0_11 = arith.constant 0 : index
    %13 = vector.load %arg5[%c0_9, %c0_10, %c0_11] : memref<1x8x128xbf16, #tpu.memory_space<vmem>>, vector<1x8x128xbf16>
    %14 = vector.shape_cast %13 : vector<1x8x128xbf16> to vector<8x128xbf16>
    %15 = vector.shape_cast %12 : vector<8x128xbf16> to vector<1x8x128xbf16>
    tpu.vector_store %arg5[%c0_9, %c0_10, %c0_11], %15 {strides = array<i32>} : memref<1x8x128xbf16, #tpu.memory_space<vmem>>, vector<1x8x128xbf16>,
    return
  }
  func.func @transform_0(%arg0: i32, %arg1: i32) -> (i32, i32, i32, i32) {
    %c0_i32 = arith.constant 0 : i32
    %c0_i32_0 = arith.constant 0 : i32
    %c0_i32_1 = arith.constant 0 : i32
    return %arg0, %c0_i32, %arg1, %c0_i32_0 : i32, i32, i32, i32
  }
  func.func @transform_1(%arg0: i32, %arg1: i32) -> (i32, i32) {
    %c0_i32 = arith.constant 0 : i32
    %c0_i32_0 = arith.constant 0 : i32
    %c0_i32_1 = arith.constant 0 : i32
    return %c0_i32, %c0_i32_0 : i32, i32
  }
  func.func @transform_2(%arg0: i32, %arg1: i32) -> (i32, i32) {
    %c0_i32 = arith.constant 0 : i32
    %c0_i32_0 = arith.constant 0 : i32
    %c0_i32_1 = arith.constant 0 : i32
    return %c0_i32, %c0_i32_0 : i32, i32
  }
  func.func @transform_3(%arg0: i32, %arg1: i32) -> (i32, i32, i32) {
    %c0_i32 = arith.constant 0 : i32
    %c0_i32_0 = arith.constant 0 : i32
    return %arg0, %arg1, %c0_i32 : i32, i32, i32
  }
}

module attributes {stable_mosaic.version = 11 : i64} {
  func.func @conv_relu_pool_kernel(%arg0: i32, %arg1: i32, %arg2: memref<1x4x8x576xbf16, #tpu.memory_space<vmem>>, %arg3: memref<576x128xbf16, #tpu.memory_space<vmem>>, %arg4: memref<1x128xf32, #tpu.memory_space<vmem>>, %arg5: memref<1x8x128xbf16, #tpu.memory_space<vmem>>) attributes {dimension_semantics = [#tpu.dimension_semantics<parallel>, #tpu.dimension_semantics<parallel>], iteration_bounds = array<i64: 2, 2>, scalar_prefetch = 0 : i64, scratch_operands = 0 : i64, tpu.core_type = #tpu.core_type<tc>, window_params = [{transform_indices = @transform_0, window_bounds = array<i64: 1, 4, 8, 576>}, {pipeline_mode = #tpu.pipeline_mode<synchronous>, transform_indices = @transform_1, window_bounds = array<i64: 576, 128>}, {pipeline_mode = #tpu.pipeline_mode<synchronous>, transform_indices = @transform_2, window_bounds = array<i64: 1, 128>}, {transform_indices = @transform_3, window_bounds = array<i64: 1, 8, 128>}]} {
    %c0 = arith.constant 0 : index
    %c0_0 = arith.constant 0 : index
    %c0_1 = arith.constant 0 : index
    %c0_2 = arith.constant 0 : index
    %0 = vector.load %arg2[%c0, %c0_0, %c0_1, %c0_2] : memref<1x4x8x576xbf16, #tpu.memory_space<vmem>>, vector<1x4x8x576xbf16>
    %1 = vector.shape_cast %0 : vector<1x4x8x576xbf16> to vector<4x8x576xbf16>
    %2 = vector.shape_cast %1 : vector<4x8x576xbf16> to vector<32x576xbf16>
    %c0_3 = arith.constant 0 : index
    %c0_4 = arith.constant 0 : index
    %3 = vector.load %arg3[%c0_3, %c0_4] : memref<576x128xbf16, #tpu.memory_space<vmem>>, vector<576x128xbf16>
    %cst = arith.constant dense<0.000000e+00> : vector<32x128xf32>
    %4 = tpu.matmul %2, %3, %cst {dimension_numbers = #tpu.dot_dimension_numbers<[1], [0], [0], [1], [0, 0, 1, 1], [], []>} : vector<32x576xbf16>, vector<576x128xbf16>, vector<32x128xf32> -> vector<32x128xf32>
    %5 = vector.shape_cast %4 : vector<32x128xf32> to vector<4x8x128xf32>
    %cst_5 = arith.constant dense<0xFF800000> : vector<8x128xf32>
    %6 = vector.multi_reduction <maximumf>, %5, %cst_5 [0] : vector<4x8x128xf32> to vector<8x128xf32>
    %c0_6 = arith.constant 0 : index
    %c0_7 = arith.constant 0 : index
    %7 = vector.load %arg4[%c0_6, %c0_7] : memref<1x128xf32, #tpu.memory_space<vmem>>, vector<1x128xf32>
    %8 = vector.broadcast %7 : vector<1x128xf32> to vector<8x128xf32>
    %9 = arith.addf %6, %8 : vector<8x128xf32>
    %cst_8 = arith.constant 0.000000e+00 : f32
    %10 = vector.broadcast %cst_8 : f32 to vector<8x128xf32>
    %11 = arith.maximumf %9, %10 : vector<8x128xf32>
    %12 = arith.truncf %11 : vector<8x128xf32> to vector<8x128xbf16>
    %c0_9 = arith.constant 0 : index
    %c0_10 = arith.constant 0 : index
    %c0_11 = arith.constant 0 : index
    %13 = vector.load %arg5[%c0_9, %c0_10, %c0_11] : memref<1x8x128xbf16, #tpu.memory_space<vmem>>, vector<1x8x128xbf16>
    %14 = vector.shape_cast %13 : vector<1x8x128xbf16> to vector<8x128xbf16>
    %15 = vector.shape_cast %12 : vector<8x128xbf16> to vector<1x8x128xbf16>
    tpu.vector_store %arg5[%c0_9, %c0_10, %c0_11], %15 {strides = array<i32>} : memref<1x8x128xbf16, #tpu.memory_space<vmem>>, vector<1x8x128xbf16>,
    return
  }
  func.func @transform_0(%arg0: i32, %arg1: i32) -> (i32, i32, i32, i32) {
    %c0_i32 = arith.constant 0 : i32
    %c0_i32_0 = arith.constant 0 : i32
    %c0_i32_1 = arith.constant 0 : i32
    return %arg0, %c0_i32, %arg1, %c0_i32_0 : i32, i32, i32, i32
  }
  func.func @transform_1(%arg0: i32, %arg1: i32) -> (i32, i32) {
    %c0_i32 = arith.constant 0 : i32
    %c0_i32_0 = arith.constant 0 : i32
    %c0_i32_1 = arith.constant 0 : i32
    return %c0_i32, %c0_i32_0 : i32, i32
  }
  func.func @transform_2(%arg0: i32, %arg1: i32) -> (i32, i32) {
    %c0_i32 = arith.constant 0 : i32
    %c0_i32_0 = arith.constant 0 : i32
    %c0_i32_1 = arith.constant 0 : i32
    return %c0_i32, %c0_i32_0 : i32, i32
  }
  func.func @transform_3(%arg0: i32, %arg1: i32) -> (i32, i32, i32) {
    %c0_i32 = arith.constant 0 : i32
    %c0_i32_0 = arith.constant 0 : i32
    return %arg0, %arg1, %c0_i32 : i32, i32, i32
  }
}

module attributes {stable_mosaic.version = 11 : i64} {
  func.func @mlp_kernel(%arg0: i32, %arg1: memref<2x1024xbf16, #tpu.memory_space<vmem>>, %arg2: memref<64x1024xbf16, #tpu.memory_space<vmem>>, %arg3: memref<1x64xf32, #tpu.memory_space<vmem>>, %arg4: memref<64x10xbf16, #tpu.memory_space<vmem>>, %arg5: memref<1x10xf32, #tpu.memory_space<vmem>>, %arg6: memref<2x10xf32, #tpu.memory_space<vmem>>, %arg7: memref<2x64xf32, #tpu.memory_space<vmem>>) attributes {dimension_semantics = [#tpu.dimension_semantics<arbitrary>], iteration_bounds = array<i64: 2>, scalar_prefetch = 0 : i64, scratch_operands = 1 : i64, tpu.core_type = #tpu.core_type<tc>, window_params = [{transform_indices = @transform_0, window_bounds = array<i64: 2, 1024>}, {transform_indices = @transform_1, window_bounds = array<i64: 64, 1024>}, {pipeline_mode = #tpu.pipeline_mode<synchronous>, transform_indices = @transform_2, window_bounds = array<i64: 1, 64>}, {pipeline_mode = #tpu.pipeline_mode<synchronous>, transform_indices = @transform_3, window_bounds = array<i64: 64, 10>}, {pipeline_mode = #tpu.pipeline_mode<synchronous>, transform_indices = @transform_4, window_bounds = array<i64: 1, 10>}, {pipeline_mode = #tpu.pipeline_mode<synchronous>, transform_indices = @transform_5, window_bounds = array<i64: 2, 10>}]} {
    %c0_i32 = arith.constant 0 : i32
    %0 = arith.cmpi eq, %arg0, %c0_i32 : i32
    %1 = arith.extui %0 : i1 to i32
    %c0_i32_0 = arith.constant 0 : i32
    %2 = arith.cmpi ne, %1, %c0_i32_0 : i32
    scf.if %2 {
      %c0_9 = arith.constant 0 : index
      %c0_10 = arith.constant 0 : index
      %12 = vector.load %arg3[%c0_9, %c0_10] : memref<1x64xf32, #tpu.memory_space<vmem>>, vector<1x64xf32>
      %13 = vector.shape_cast %12 : vector<1x64xf32> to vector<1x64xf32>
      %14 = vector.broadcast %13 : vector<1x64xf32> to vector<2x64xf32>
      %c0_11 = arith.constant 0 : index
      %c0_12 = arith.constant 0 : index
      %15 = vector.load %arg7[%c0_11, %c0_12] : memref<2x64xf32, #tpu.memory_space<vmem>>, vector<2x64xf32>
      tpu.vector_store %arg7[%c0_11, %c0_12], %14 {strides = array<i32>} : memref<2x64xf32, #tpu.memory_space<vmem>>, vector<2x64xf32>,
    } else {
    }
    %c0 = arith.constant 0 : index
    %c0_1 = arith.constant 0 : index
    %3 = vector.load %arg7[%c0, %c0_1] : memref<2x64xf32, #tpu.memory_space<vmem>>, vector<2x64xf32>
    %c0_2 = arith.constant 0 : index
    %c0_3 = arith.constant 0 : index
    %4 = vector.load %arg1[%c0_2, %c0_3] : memref<2x1024xbf16, #tpu.memory_space<vmem>>, vector<2x1024xbf16>
    %c0_4 = arith.constant 0 : index
    %c0_5 = arith.constant 0 : index
    %5 = vector.load %arg2[%c0_4, %c0_5] : memref<64x1024xbf16, #tpu.memory_space<vmem>>, vector<64x1024xbf16>
    %cst = arith.constant dense<0.000000e+00> : vector<2x64xf32>
    %6 = tpu.matmul %4, %5, %cst {dimension_numbers = #tpu.dot_dimension_numbers<[1], [1], [0], [0], [0, 0, 1, 0], [], []>} : vector<2x1024xbf16>, vector<64x1024xbf16>, vector<2x64xf32> -> vector<2x64xf32>
    %7 = arith.addf %3, %6 : vector<2x64xf32>
    %c0_6 = arith.constant 0 : index
    %c0_7 = arith.constant 0 : index
    %8 = vector.load %arg7[%c0_6, %c0_7] : memref<2x64xf32, #tpu.memory_space<vmem>>, vector<2x64xf32>
    tpu.vector_store %arg7[%c0_6, %c0_7], %7 {strides = array<i32>} : memref<2x64xf32, #tpu.memory_space<vmem>>, vector<2x64xf32>,
    %c1_i32 = arith.constant 1 : i32
    %9 = arith.cmpi eq, %arg0, %c1_i32 : i32
    %10 = arith.extui %9 : i1 to i32
    %c0_i32_8 = arith.constant 0 : i32
    %11 = arith.cmpi ne, %10, %c0_i32_8 : i32
    scf.if %11 {
      %c0_9 = arith.constant 0 : index
      %c0_10 = arith.constant 0 : index
      %12 = vector.load %arg7[%c0_9, %c0_10] : memref<2x64xf32, #tpu.memory_space<vmem>>, vector<2x64xf32>
      %cst_11 = arith.constant 0.000000e+00 : f32
      %13 = vector.broadcast %cst_11 : f32 to vector<2x64xf32>
      %14 = arith.maximumf %12, %13 : vector<2x64xf32>
      %15 = arith.truncf %14 : vector<2x64xf32> to vector<2x64xbf16>
      %c0_12 = arith.constant 0 : index
      %c0_13 = arith.constant 0 : index
      %16 = vector.load %arg4[%c0_12, %c0_13] : memref<64x10xbf16, #tpu.memory_space<vmem>>, vector<64x10xbf16>
      %cst_14 = arith.constant dense<0.000000e+00> : vector<2x10xf32>
      %17 = tpu.matmul %15, %16, %cst_14 {dimension_numbers = #tpu.dot_dimension_numbers<[1], [0], [0], [1], [0, 0, 1, 1], [], []>} : vector<2x64xbf16>, vector<64x10xbf16>, vector<2x10xf32> -> vector<2x10xf32>
      %c0_15 = arith.constant 0 : index
      %c0_16 = arith.constant 0 : index
      %18 = vector.load %arg5[%c0_15, %c0_16] : memref<1x10xf32, #tpu.memory_space<vmem>>, vector<1x10xf32>
      %19 = vector.broadcast %18 : vector<1x10xf32> to vector<2x10xf32>
      %20 = arith.addf %17, %19 : vector<2x10xf32>
      %c0_17 = arith.constant 0 : index
      %c0_18 = arith.constant 0 : index
      %21 = vector.load %arg6[%c0_17, %c0_18] : memref<2x10xf32, #tpu.memory_space<vmem>>, vector<2x10xf32>
      tpu.vector_store %arg6[%c0_17, %c0_18], %20 {strides = array<i32>} : memref<2x10xf32, #tpu.memory_space<vmem>>, vector<2x10xf32>,
    } else {
    }
    return
  }
  func.func @transform_0(%arg0: i32) -> (i32, i32) {
    %c0_i32 = arith.constant 0 : i32
    %c0_i32_0 = arith.constant 0 : i32
    return %c0_i32, %arg0 : i32, i32
  }
  func.func @transform_1(%arg0: i32) -> (i32, i32) {
    %c0_i32 = arith.constant 0 : i32
    %c0_i32_0 = arith.constant 0 : i32
    return %c0_i32, %arg0 : i32, i32
  }
  func.func @transform_2(%arg0: i32) -> (i32, i32) {
    %c0_i32 = arith.constant 0 : i32
    %c0_i32_0 = arith.constant 0 : i32
    %c0_i32_1 = arith.constant 0 : i32
    return %c0_i32, %c0_i32_0 : i32, i32
  }
  func.func @transform_3(%arg0: i32) -> (i32, i32) {
    %c0_i32 = arith.constant 0 : i32
    %c0_i32_0 = arith.constant 0 : i32
    %c0_i32_1 = arith.constant 0 : i32
    return %c0_i32, %c0_i32_0 : i32, i32
  }
  func.func @transform_4(%arg0: i32) -> (i32, i32) {
    %c0_i32 = arith.constant 0 : i32
    %c0_i32_0 = arith.constant 0 : i32
    %c0_i32_1 = arith.constant 0 : i32
    return %c0_i32, %c0_i32_0 : i32, i32
  }
  func.func @transform_5(%arg0: i32) -> (i32, i32) {
    %c0_i32 = arith.constant 0 : i32
    %c0_i32_0 = arith.constant 0 : i32
    %c0_i32_1 = arith.constant 0 : i32
    return %c0_i32, %c0_i32_0 : i32, i32
  }
}

</mosaic_0001>

<bundles_post_ra>
// kernel: serina_forward.3
= control target key start
LH: loop header
LB: loop body
LE: loop exit
PB: predicated region body
PF: predicated region fallthrough
CT: control target
= control target key end

     0   :  { %s645_s12 = smov 0   ;;  %s647_s13 = smov 0   ;;  %s754_s0 = inlined_call_operand.vmem [shape: bf16[2,4,32,72], index: 0, kind: input, shape index: {}]   ;;  %s755_s1 = inlined_call_operand.vmem [shape: bf16[72,128], index: 1, kind: input, shape index: {}]   ;;  %s756_s2 = inlined_call_operand.vmem [shape: f32[1,128], index: 2, kind: input, shape index: {}]   ;;  %s757_s3 = inlined_call_operand.vmem [shape: bf16[2,32,128], index: 3, kind: output, shape index: {}]  }
   0x1   :  { %s649_s14 = smov 0   ;;  %s651_s15 = smov 0  }
   0x2   :  { %s653_s16 = smov 0   ;;  %s655_s17 = smov 0  }
   0x3   :  { %s657_s18 = smov 0  }
   0x4 LB: > { %s22_s19 = sadd.s32 1, %s615_s16  ;;  %s25_s20 = sadd.s32 1, %s619_s17  ;;  %s623_s18 = sphi %s657_s18, %s13_s18   ;;  %s619_s17 = sphi %s655_s17, %s763_s17   ;;  %s615_s16 = sphi %s653_s16, %s762_s16   ;;  %s611_s15 = sphi %s651_s15, %s761_s15   ;;  %s607_s14 = sphi %s649_s14, %s760_s14   ;;  %s603_s13 = sphi %s647_s13, %s759_s13   ;;  %s599_s12 = sphi %s645_s12, %s758_s12  }
   0x5   : > { %p23_p0 = scmp.ge.s32.totalorder %s22_s19, 4  ;;  %p41_p1 = scmp.ne.s32.totalorder %s603_s13, %s599_s12 }
   0x6   : > { %p42_p2 = scmp.eq.s32.totalorder %s623_s18, 0  ;;  %s34_s24 = sadd.s32 1, %s603_s13 }
   0x7   : > { %s765_s19 = smov (%p23_p0, %s22_s19), 0  ;;  %s767_s20 = smov (!%p23_p0, %s25_s20), %s619_s17 }
   0x8   : > { %p43_p3 = por %p42_p2, %p41_p1  ;;  %p27_p4 = scmp.ge.s32.totalorder %s767_s20, 2 }
   0x9   : > { %s30_s21 = ssub.s32 %s615_s16, %s765_s19  ;;  %p464_p6 = scmp.ge.s32.totalorder %s623_s18, 8 }
   0xa   : > { %s769_s20 = smov (%p27_p4, %s767_s20), 0 }
   0xb   : > { %s29_s22 = ssub.s32 %s619_s17, %s769_s20  ;;  %143 = sbr.rel (%p464_p6) target bundleno = 27 (0x1b), region = 24 }
   0xc   : > { %s31_s23 = sor.u32 %s30_s21, %s29_s22 }
   0xd   : > { %p32_p5 = scmp.eq.s32.totalorder %s31_s23, 0 }
   0xf   : > { %s696_s25 = scalar_select %p32_p5, %s603_s13, %s34_s24  }
  0x12   : > { %146 = sbr.rel (!%p43_p3) target bundleno = 27 (0x1b), region = 28  ;;  %s148_s26 = sand.u32 (%p43_p3), 1, %s603_s13  }
  0x13   : > { %s466_s27 = sshll.u32 (%p43_p3), %s619_s17, 4  ;;  %s465_s28 = sshll.u32 (%p43_p3), %s148_s26, 4 }
  0x14   : > { %s152_s29 = sadd.s32 (%p43_p3), %s615_s16, %s466_s27  ;;  %s150_s7 = scalar_lea.vmem (%p43_p3), [#allocation2], %s465_s28 }
  0x15   : > { %s467_s30 = sshll.u32 (%p43_p3), %s152_s29, 2 }
  0x16   : > { %s154_s6 = scalar_lea.vmem (%p43_p3), %s754_s0, %s467_s30 }
  0x17   : > { %v170_v0 = vld [vmem:[%s154_s6] sm:$0xf] (%p43_p3)  ;;  %v172_v1 = vld [vmem:[%s154_s6 + $0x10] sm:$0xf] (%p43_p3) }
  0x18   : > { %v174_v2 = vld [vmem:[%s154_s6 + $0x20] sm:$0xf] (%p43_p3)  ;;  %171 = vst [vmem:[%s150_s7] sm:$0xf] (%p43_p3), %v170_v0  ;;  %173 = vst [vmem:[%s150_s7 + $0x4] sm:$0xf] (%p43_p3), %v172_v1 }
  0x19   : > { %175 = vst [vmem:[%s150_s7 + $0x8] sm:$0xf] %v174_v2  ;;  %v176_v3 = vld [vmem:[%s154_s6 + $0x30] sm:$0xf] }
  0x1a   : > { %177 = vst [vmem:[%s150_s7 + $0xc] sm:$0xf] %v176_v3 }
  0x1b PF: > { %p468_p7 = scmp.ge.s32.totalorder %s623_s18, 1  ;;  %p207_p8 = scmp.lt.s32.totalorder %s623_s18, 9 }
  0x1d   : > { %p208_p9 = pnand %p468_p7, %p207_p8 }
  0x1e   : > { %v562_v4 = vld [vmem:[%s755_s1] sm:$0xff] (!%p208_p9)   ;;  %v563_v5 = vld [vmem:[%s755_s1 + $0x8] sm:$0xff] (!%p208_p9)   ;;  %s214_s21 = sand.u32 (!%p208_p9), 1, %s599_s12   ;;  %v564_v6 = vld [vmem:[%s755_s1 + $0x10] sm:$0xff] (!%p208_p9)   ;;  %vm299_vm0 = vcmask (!%p208_p9), 588800   ;;  %vm306_vm1 = vcmask (!%p208_p9), 1043456  }
  0x1f   : > { %211 = sbr.rel (%p208_p9) target bundleno = 277 (0x115), region = 69  ;;  %491 = vmatprep.subr.bf16.mxu0 (!%p208_p9), %v562_v4  ;;  %s469_s22 = sshll.u32 (!%p208_p9), %s214_s21, 4  ;;  %v565_v8 = vld [vmem:[%s755_s1 + $0x18] sm:$0xff] (!%p208_p9)   ;;  %v566_v9 = vld [vmem:[%s755_s1 + $0x20] ss:$0 sps:$4 sm:$0xff] (!%p208_p9)  }
  0x20   : > { %492 = vmatpush3.bf16.msra.mxu0 (!%p208_p9), %v562_v4  ;;  %s216_s26 = scalar_lea.vmem (!%p208_p9), [#allocation2], %s469_s22  ;;  %v308_v10 = vsel (!%p208_p9), %vm306_vm1, %v566_v9, 0  ;;  %p240_p10 = scmp.lt.s32.totalorder (!%p208_p9), %s611_s15, 1  ;;  %v481_v18 = vld [vmem:[%s756_s2] ss:$0 sm:$0xff] (!%p208_p9) }
  0x21   : > { %493 = vmatprep.subr.bf16.mxu0 (!%p208_p9), %v563_v5  ;;  %v567_v7 = vld [vmem:[%s216_s26] sm:$0xff] (!%p208_p9)   ;;  %v568_v11 = vld [vmem:[%s216_s26 + $0x8] sm:$0xff] (!%p208_p9)   ;;  %p242_p11 = scmp.lt.s32.totalorder (!%p208_p9), %s607_s14, 3 }
  0x22   : > { %501 = vmatprep.mubr.msk.bf16.mxu0 (!%p208_p9), %vm299_vm0, %v567_v7 }
  0x24   : > { %494 = vmatpush3.bf16.msra.mxu0 (!%p208_p9), %v563_v5 }
  0x25   : > { %495 = vmatprep.subr.bf16.mxu0 (!%p208_p9), %v564_v6 }
  0x26   : > { %s771_s15 = smov (!%p240_p10, %s611_s15), 1  ;;  %s773_s14 = smov (!%p242_p11, %s607_s14), 3 }
  0x27   : > { %s470_s30 = sshll.u32 %s771_s15, 2 }
  0x28   : > { %496 = vmatpush3.bf16.msra.mxu0 %v564_v6  ;;  %s245_s4 = sadd.s32 %s470_s30, %s773_s14 }
  0x29   : > { %497 = vmatprep.subr.bf16.mxu0 %v565_v8  ;;  %s471_s7 = sshll.u32 %s245_s4, 2 }
  0x2a   : > { %s247_s10 = scalar_lea.vmem %s757_s3, %s471_s7 }
  0x2c   : > { %498 = vmatpush3.bf16.msra.mxu0 %v565_v8 }
  0x2d   : > { %505 = vmatprep.subr.msk.bf16.mxu0 %vm306_vm1, %v566_v9 }
  0x30   : > { %500 = vmatpush3.bf16.msra.mxu0 %v308_v10 }
  0x33   : > { %502 = vmatmul.mubr.msk.bf16.vlgmr.msra.gmra.mrb[0].mxu0 %vm299_vm0, %v568_v11 }
 0x106   : > { %v503_v12 = vpop.f32.mrb[0].mxu0 }
 0x107   : > { %v344_v13 = vpop.f32.mrb[1].mxu0 }
 0x108   : > { %v504_v14 = vpop.f32.mrb[2].mxu0 }
 0x109   : > { %v360_v15 = vmax.f32 %v503_v12, %v504_v14  ;;  %v347_v16 = vpop.f32.mrb[3].mxu0 }
 0x10a   : > { %v359_v17 = vmax.f32 %v344_v13, %v347_v16 }
 0x10c   : > { %v361_v19 = vmax.f32 %v359_v17, %v360_v15 }
 0x10e   : > { %v369_v20 = vadd.f32 %v481_v18, %v361_v19 }
 0x110   : > { %v370_v21 = vmax.f32 %v369_v20, 0.0 }
 0x112   : > { %v371_v22 = vpack.c.bf16 %v370_v21, %v370_v21 }
 0x114   : > { %372 = vst [vmem:[%s247_s10] sm:$0xf] %v371_v22 }
 0x115 PF: > { %s13_s18 = sadd.s32 1, %s623_s18   ;;  %s758_s12 = smov %s603_s13 }
 0x116   : > { %p10_p12 = scmp.ge.s32.totalorder %s13_s18, 10   ;;  %s759_s13 = smov %s696_s25 }
 0x117   : > { %s760_s14 = smov %s615_s16  ;;  %s761_s15 = smov %s619_s17 }
 0x118   : > { %s762_s16 = smov %s765_s19  ;;  %s763_s17 = smov %s769_s20 }
 0x119   :  { %12 = sbr.rel (!%p10_p12) target bundleno = 4 (0x4), region = 108 }

// kernel: serina_forward.4
= control target key start
LH: loop header
LB: loop body
LE: loop exit
PB: predicated region body
PF: predicated region fallthrough
CT: control target
= control target key end

     0   :  { %s1185_s12 = smov 0   ;;  %s1187_s13 = smov 0   ;;  %s1399_s0 = inlined_call_operand.vmem [shape: bf16[2,4,16,576], index: 0, kind: input, shape index: {}]   ;;  %s1400_s1 = inlined_call_operand.vmem [shape: bf16[576,128], index: 1, kind: input, shape index: {}]   ;;  %s1401_s2 = inlined_call_operand.vmem [shape: f32[1,128], index: 2, kind: input, shape index: {}]   ;;  %s1402_s3 = inlined_call_operand.vmem [shape: bf16[2,16,128], index: 3, kind: output, shape index: {}]  }
   0x1   :  { %s1189_s14 = smov 0   ;;  %s1191_s15 = smov 0  }
   0x2   :  { %s1193_s16 = smov 0   ;;  %s1195_s17 = smov 0  }
   0x3   :  { %s1197_s18 = smov 0  }
   0x4 LB: > { %s22_s19 = sadd.s32 1, %s1155_s16  ;;  %s25_s20 = sadd.s32 1, %s1159_s17  ;;  %s1163_s18 = sphi %s1197_s18, %s13_s18   ;;  %s1159_s17 = sphi %s1195_s17, %s1408_s17   ;;  %s1155_s16 = sphi %s1193_s16, %s1407_s16   ;;  %s1151_s15 = sphi %s1191_s15, %s1406_s15   ;;  %s1147_s14 = sphi %s1189_s14, %s1405_s14   ;;  %s1143_s13 = sphi %s1187_s13, %s1404_s13   ;;  %s1139_s12 = sphi %s1185_s12, %s1403_s12  }
   0x5   : > { %p23_p0 = scmp.ge.s32.totalorder %s22_s19, 2  ;;  %p41_p1 = scmp.ne.s32.totalorder %s1143_s13, %s1139_s12 }
   0x6   : > { %p42_p2 = scmp.eq.s32.totalorder %s1163_s18, 0  ;;  %s34_s24 = sadd.s32 1, %s1143_s13 }
   0x7   : > { %s1410_s19 = smov (%p23_p0, %s22_s19), 0  ;;  %s1412_s20 = smov (!%p23_p0, %s25_s20), %s1159_s17 }
   0x8   : > { %p43_p3 = por %p42_p2, %p41_p1  ;;  %p27_p4 = scmp.ge.s32.totalorder %s1412_s20, 2 }
   0x9   : > { %s30_s21 = ssub.s32 %s1155_s16, %s1410_s19  ;;  %p861_p6 = scmp.ge.s32.totalorder %s1163_s18, 4 }
   0xa   : > { %s1414_s20 = smov (%p27_p4, %s1412_s20), 0 }
   0xb   : > { %s29_s22 = ssub.s32 %s1159_s17, %s1414_s20  ;;  %143 = sbr.rel (%p861_p6) target bundleno = 33 (0x21), region = 24 }
   0xc   : > { %s31_s23 = sor.u32 %s30_s21, %s29_s22 }
   0xd   : > { %p32_p5 = scmp.eq.s32.totalorder %s31_s23, 0 }
   0xf   : > { %s1236_s25 = scalar_select %p32_p5, %s1143_s13, %s34_s24  }
  0x12   : > { %146 = sbr.rel (!%p43_p3) target bundleno = 33 (0x21), region = 28  ;;  %s148_s26 = sand.u32 (%p43_p3), 1, %s1143_s13  }
  0x13   : > { %s1000_s27 = smul.u32 (%p43_p3), 5, %s1155_s16 }
  0x14   : > { %s999_s28 = smul.u32 (%p43_p3), 80, %s148_s26 }
  0x15   : > { %s1001_s29 = smul.u32 (%p43_p3), 40, %s1159_s17 }
  0x16   : > { %s150_s8 = scalar_lea.vmem (%p43_p3), [#allocation2], %s999_s28 }
  0x17   : > { %s153_s30 = sadd.s32 (%p43_p3), %s1001_s29, %s1000_s27 }
  0x18   : > { %s862_s4 = sshll.u32 (%p43_p3), %s153_s30, 2 }
  0x19   : > { %s155_s7 = scalar_lea.vmem %s1399_s0, %s862_s4 }
  0x1a   : > { %v170_v0 = vld [vmem:[%s155_s7] sm:$0xff]  ;;  %v172_v1 = vld [vmem:[%s155_s7 + $0x8] sm:$0xff]  ;;  %v176_v3 = vld [vmem:[%s155_s7 + $0x30] sm:$0xff] }
  0x1b   : > { %v174_v2 = vld [vmem:[%s155_s7 + $0x28] sm:$0xff]  ;;  %171 = vst [vmem:[%s150_s8] sm:$0xff] %v170_v0  ;;  %173 = vst [vmem:[%s150_s8 + $0x8] sm:$0xff] %v172_v1  ;;  %v178_v4 = vld [vmem:[%s155_s7 + $0x50] sm:$0xff] }
  0x1c   : > { %175 = vst [vmem:[%s150_s8 + $0x14] sm:$0xff] %v174_v2  ;;  %v180_v5 = vld [vmem:[%s155_s7 + $0x58] sm:$0xff]  ;;  %177 = vst [vmem:[%s150_s8 + $0x1c] sm:$0xff] %v176_v3  ;;  %v184_v7 = vld [vmem:[%s155_s7 + $0x80] sm:$0xff] }
  0x1d   : > { %179 = vst [vmem:[%s150_s8 + $0x28] sm:$0xff] %v178_v4  ;;  %181 = vst [vmem:[%s150_s8 + $0x30] sm:$0xff] %v180_v5  ;;  %v182_v6 = vld [vmem:[%s155_s7 + $0x78] sm:$0xff]  ;;  %v863_v8 = vld [vmem:[%s155_s7 + $0x10] sm:$0xf] }
  0x1e   : > { %183 = vst [vmem:[%s150_s8 + $0x3c] sm:$0xff] %v182_v6  ;;  %185 = vst [vmem:[%s150_s8 + $0x44] sm:$0xff] %v184_v7  ;;  %v865_v9 = vld [vmem:[%s155_s7 + $0x38] sm:$0xf]  ;;  %v867_v10 = vld [vmem:[%s155_s7 + $0x60] sm:$0xf] }
  0x1f   : > { %864 = vst [vmem:[%s150_s8 + $0x10] sm:$0xf] %v863_v8  ;;  %v869_v11 = vld [vmem:[%s155_s7 + $0x88] sm:$0xf]  ;;  %866 = vst [vmem:[%s150_s8 + $0x24] sm:$0xf] %v865_v9 }
  0x20   : > { %868 = vst [vmem:[%s150_s8 + $0x38] sm:$0xf] %v867_v10  ;;  %870 = vst [vmem:[%s150_s8 + $0x4c] sm:$0xf] %v869_v11 }
  0x21 PF: > { %p871_p7 = scmp.ge.s32.totalorder %s1163_s18, 1  ;;  %p205_p8 = scmp.lt.s32.totalorder %s1163_s18, 5 }
  0x23   : > { %p206_p9 = pnand %p871_p7, %p205_p8 }
  0x24   : > { %v1059_v12 = vld [vmem:[%s1400_s1 + $0x40] sm:$0xff] (!%p206_p9)   ;;  %v1063_v16 = vld [vmem:[%s1400_s1 + $0x48] sm:$0xff] (!%p206_p9)   ;;  %v1067_v20 = vld [vmem:[%s1400_s1 + $0x50] sm:$0xff] (!%p206_p9)   ;;  %s212_s4 = sand.u32 (!%p206_p9), 1, %s1139_s12   ;;  %vm597_vm0 = vcmask (!%p206_p9), 523264   ;;  %p238_p10 = scmp.lt.s32.totalorder (!%p206_p9), %s1151_s15, 1 }
  0x25   : > { %209 = sbr.rel (%p206_p9) target bundleno = 315 (0x13b), region = 54  ;;  %v1060_v13 = vld [vmem:[%s1400_s1 + $0xc0] sm:$0xff] (!%p206_p9)   ;;  %925 = vmatprep.subr.bf16.mxu0 (!%p206_p9), %v1059_v12  ;;  %v1064_v17 = vld [vmem:[%s1400_s1 + $0xc8] sm:$0xff] (!%p206_p9)   ;;  %v1068_v21 = vld [vmem:[%s1400_s1 + $0xd0] sm:$0xff] (!%p206_p9)   ;;  %p240_p11 = scmp.lt.s32.totalorder (!%p206_p9), %s1147_s14, 1 }
  0x26   : > { %v1061_v14 = vld [vmem:[%s1400_s1] sm:$0xff] (!%p206_p9)   ;;  %953 = vmatprep.subr.bf16.mxu1 (!%p206_p9), %v1060_v13  ;;  %v1065_v18 = vld [vmem:[%s1400_s1 + $0x8] sm:$0xff] (!%p206_p9)   ;;  %v1069_v22 = vld [vmem:[%s1400_s1 + $0x10] sm:$0xff] (!%p206_p9)   ;;  %s1002_s11 = smul.u32 (!%p206_p9), 80, %s212_s4 }
  0x27   : > { %v1062_v15 = vld [vmem:[%s1400_s1 + $0x80] sm:$0xff] (!%p206_p9)   ;;  %926 = vmatpush3.bf16.msra.mxu0 (!%p206_p9), %v1061_v14  ;;  %v1066_v19 = vld [vmem:[%s1400_s1 + $0x88] sm:$0xff] (!%p206_p9)   ;;  %v1070_v23 = vld [vmem:[%s1400_s1 + $0x90] sm:$0xff] (!%p206_p9)  }
  0x28   : > { %954 = vmatpush3.bf16.msra.mxu1 (!%p206_p9), %v1062_v15  ;;  %927 = vmatprep.subr.bf16.mxu0 (!%p206_p9), %v1063_v16  ;;  %v1071_v24 = vld [vmem:[%s1400_s1 + $0x58] sm:$0xff] (!%p206_p9)   ;;  %v1075_v28 = vld [vmem:[%s1400_s1 + $0x60] sm:$0xff] (!%p206_p9)   ;;  %v1079_v32 = vld [vmem:[%s1400_s1 + $0x68] sm:$0xff] (!%p206_p9)   ;;  %s1344_s6 = scalar_lea.vmem (!%p206_p9), [#allocation2], %s1002_s11 }
  0x29   : > { %955 = vmatprep.subr.bf16.mxu1 (!%p206_p9), %v1064_v17  ;;  %v1072_v25 = vld [vmem:[%s1400_s1 + $0xd8] sm:$0xff] (!%p206_p9)   ;;  %v1076_v29 = vld [vmem:[%s1400_s1 + $0xe0] sm:$0xff] (!%p206_p9)   ;;  %v1080_v33 = vld [vmem:[%s1400_s1 + $0xe8] sm:$0xff] (!%p206_p9)  }
  0x2a   : > { %v1073_v26 = vld [vmem:[%s1400_s1 + $0x18] sm:$0xff] (!%p206_p9)   ;;  %v1077_v30 = vld [vmem:[%s1400_s1 + $0x20] sm:$0xff] (!%p206_p9)   ;;  %v1081_v34 = vld [vmem:[%s1400_s1 + $0x28] sm:$0xff] (!%p206_p9)  }
  0x2b   : > { %928 = vmatpush3.bf16.msra.mxu0 (!%p206_p9), %v1065_v18  ;;  %v1074_v27 = vld [vmem:[%s1400_s1 + $0x98] sm:$0xff] (!%p206_p9)   ;;  %v1078_v31 = vld [vmem:[%s1400_s1 + $0xa0] sm:$0xff] (!%p206_p9)   ;;  %v1082_v35 = vld [vmem:[%s1400_s1 + $0xa8] sm:$0xff] (!%p206_p9)  }
  0x2c   : > { %956 = vmatpush3.bf16.msra.mxu1 %v1066_v19  ;;  %929 = vmatprep.subr.bf16.mxu0 %v1067_v20  ;;  %v1083_v36 = vld [vmem:[%s1400_s1 + $0x70] sm:$0xff]   ;;  %v1087_v40 = vld [vmem:[%s1400_s1 + $0x78] sm:$0xff]   ;;  %v1097_v48 = vld [vmem:[%s1400_s1 + $0x100] sm:$0xff]   ;;  %s1416_s15 = smov (!%p238_p10, %s1151_s15), 1  ;;  %s1418_s14 = smov (!%p240_p11, %s1147_s14), 1 }
  0x2d   : > { %957 = vmatprep.subr.bf16.mxu1 %v1068_v21  ;;  %v1084_v37 = vld [vmem:[%s1400_s1 + $0xf0] sm:$0xff]   ;;  %v1088_v41 = vld [vmem:[%s1400_s1 + $0xf8] sm:$0xff]   ;;  %v1098_v49 = vld [vmem:[%s1400_s1 + $0x108] sm:$0xff]   ;;  %s872_s23 = sshll.u32 %s1416_s15, 1 }
  0x2e   : > { %v1085_v38 = vld [vmem:[%s1400_s1 + $0x30] sm:$0xff]   ;;  %v1089_v42 = vld [vmem:[%s1400_s1 + $0x38] sm:$0xff]   ;;  %s243_s24 = sadd.s32 %s872_s23, %s1418_s14 }
  0x2f   : > { %930 = vmatpush3.bf16.msra.mxu0 %v1069_v22  ;;  %v1086_v39 = vld [vmem:[%s1400_s1 + $0xb0] sm:$0xff]   ;;  %v1090_v43 = vld [vmem:[%s1400_s1 + $0xb8] sm:$0xff]   ;;  %s873_s28 = sshll.u32 %s243_s24, 2 }
  0x30   : > { %958 = vmatpush3.bf16.msra.mxu1 %v1070_v23  ;;  %931 = vmatprep.subr.bf16.mxu0 %v1071_v24  ;;  %v1091_v44 = vld [vmem:[%s1344_s6] ss:$20 sps:$4 sm:$0xff]   ;;  %v1093_v45 = vld [vmem:[%s1344_s6 + $0x4] ss:$20 sps:$4 sm:$0xff]   ;;  %v1094_v46 = vld [vmem:[%s1344_s6 + $0x8] ss:$20 sps:$4 sm:$0xff]   ;;  %s245_s4 = scalar_lea.vmem %s1402_s3, %s873_s28 }
  0x31   : > { %959 = vmatprep.subr.bf16.mxu1 %v1072_v25  ;;  %v1096_v47 = vld [vmem:[%s1344_s6 + $0xc] ss:$20 sps:$4 sm:$0xff]   ;;  %636 = vmatprep.mubr.bf16.mxu0 %v1093_v45  ;;  %v1101_v51 = vld [vmem:[%s1344_s6 + $0x34] ss:$20 sps:$4 sm:$0xff]   ;;  %v1104_v54 = vld [vmem:[%s1344_s6 + $0x30] ss:$20 sps:$4 sm:$0xff]  }
  0x32   : > { %685 = vmatprep.mubr.bf16.mxu1 %v1096_v47  ;;  %v1099_v50 = vld [vmem:[%s1344_s6 + $0x2c] ss:$20 sps:$4 sm:$0xff]   ;;  %v1103_v52 = vld [vmem:[%s1344_s6 + $0x28] ss:$20 sps:$4 sm:$0xff]   ;;  %v1107_v55 = vld [vmem:[%s1344_s6 + $0x10] ss:$20 sps:$4 sm:$0xff]  }
  0x33   : > { %932 = vmatpush3.bf16.msra.mxu0 %v1073_v26  ;;  %v1105_v53 = vld [vmem:[%s1400_s1 + $0x110] sm:$0xff]   ;;  %v1106_v56 = vld [vmem:[%s1400_s1 + $0x118] sm:$0xff]  }
  0x34   : > { %960 = vmatpush3.bf16.msra.mxu1 %v1074_v27  ;;  %933 = vmatprep.subr.bf16.mxu0 %v1075_v28  ;;  %v1108_v57 = vld [vmem:[%s1344_s6 + $0x38] ss:$20 sps:$4 sm:$0xff]  }
  0x35   : > { %961 = vmatprep.subr.bf16.mxu1 %v1076_v29 }
  0x37   : > { %934 = vmatpush3.bf16.msra.mxu0 %v1077_v30 }
  0x38   : > { %962 = vmatpush3.bf16.msra.mxu1 %v1078_v31  ;;  %935 = vmatprep.subr.bf16.mxu0 %v1079_v32  ;;  %v922_v32 = vld [vmem:[%s1401_s2] ss:$0 sm:$0xff] }
  0x39   : > { %963 = vmatprep.subr.bf16.mxu1 %v1080_v33 }
  0x3b   : > { %936 = vmatpush3.bf16.msra.mxu0 %v1081_v34 }
  0x3c   : > { %964 = vmatpush3.bf16.msra.mxu1 %v1082_v35  ;;  %937 = vmatprep.subr.bf16.mxu0 %v1083_v36 }
  0x3d   : > { %965 = vmatprep.subr.bf16.mxu1 %v1084_v37 }
  0x3f   : > { %938 = vmatpush3.bf16.msra.mxu0 %v1085_v38 }
  0x40   : > { %966 = vmatpush3.bf16.msra.mxu1 %v1086_v39  ;;  %939 = vmatprep.subr.bf16.mxu0 %v1087_v40 }
  0x41   : > { %967 = vmatprep.subr.bf16.mxu1 %v1088_v41 }
  0x43   : > { %940 = vmatpush3.bf16.msra.mxu0 %v1089_v42 }
  0x44   : > { %968 = vmatpush3.bf16.msra.mxu1 %v1090_v43  ;;  %987 = vmatprep.subr.bf16.mxu0 %v1097_v48 }
  0x46   : > { %637 = vmatmul.mubr.bf16.vlgmr.msra.gmra.mrb[0].mxu0 %v1091_v44 }
  0x47   : > { %686 = vmatmul.mubr.bf16.vlgmr.msra.gmra.mrb[0].mxu1 %v1094_v46  ;;  %988 = vmatpush3.bf16.msra.mxu0 %v1097_v48 }
  0x48   : > { %989 = vmatprep.subr.bf16.mxu0 %v1098_v49  ;;  %644 = vmatprep.mubr.bf16.mxu0 %v1099_v50 }
  0x49   : > { %693 = vmatprep.mubr.bf16.mxu1 %v1101_v51 }
  0x4b   : > { %990 = vmatpush3.bf16.msra.mxu0 %v1098_v49 }
  0x4c   : > { %991 = vmatprep.subr.bf16.mxu0 %v1105_v53 }
  0x4e   : > { %645 = vmatmul.mubr.bf16.gmra.mrb[4].mxu0 %v1103_v52 }
  0x4f   : > { %694 = vmatmul.mubr.bf16.gmra.mrb[4].mxu1 %v1104_v54  ;;  %995 = vmatprep.mubr.msk.bf16.mxu0 %vm597_vm0, %v1107_v55 }
  0x50   : > { %992 = vmatpush3.bf16.msra.mxu0 %v1105_v53 }
  0x51   : > { %993 = vmatprep.subr.bf16.mxu0 %v1106_v56 }
  0x54   : > { %994 = vmatpush3.bf16.msra.mxu0 %v1106_v56 }
  0x57   : > { %996 = vmatmul.mubr.msk.bf16.vlgmr.msra.gmra.mrb[8].mxu0 %vm597_vm0, %v1108_v57 }
 0x119   : > { %v941_v58 = vpop.f32.mrb[0].mxu0 }
 0x11a   : > { %v969_v59 = vpop.f32.mrb[0].mxu1  ;;  %v942_v60 = vpop.f32.mrb[1].mxu0 }
 0x11b   : > { %v943_v61 = vadd.f32 %v942_v60, %v941_v58  ;;  %v970_v62 = vpop.f32.mrb[1].mxu1  ;;  %v944_v63 = vpop.f32.mrb[2].mxu0 }
 0x11c   : > { %v971_v0 = vadd.f32 %v970_v62, %v969_v59  ;;  %v972_v1 = vpop.f32.mrb[2].mxu1  ;;  %v945_v2 = vpop.f32.mrb[3].mxu0 }
 0x11d   : > { %v946_v3 = vadd.f32 %v945_v2, %v944_v63  ;;  %v973_v4 = vpop.f32.mrb[3].mxu1 }
 0x11e   : > { %v974_v5 = vadd.f32 %v973_v4, %v972_v1  ;;  %v688_v6 = vadd.f32 %v971_v0, %v943_v61 }
 0x120   : > { %v691_v7 = vadd.f32 %v974_v5, %v946_v3 }
 0x121   : > { %v947_v8 = vpop.f32.mrb[4].mxu0 }
 0x122   : > { %v975_v9 = vpop.f32.mrb[4].mxu1  ;;  %v948_v10 = vpop.f32.mrb[5].mxu0 }
 0x123   : > { %v949_v11 = vadd.f32 %v948_v10, %v947_v8  ;;  %v976_v12 = vpop.f32.mrb[5].mxu1  ;;  %v950_v13 = vpop.f32.mrb[6].mxu0 }
 0x124   : > { %v977_v14 = vadd.f32 %v976_v12, %v975_v9  ;;  %v978_v15 = vpop.f32.mrb[6].mxu1  ;;  %v951_v16 = vpop.f32.mrb[7].mxu0 }
 0x125   : > { %v952_v17 = vadd.f32 %v951_v16, %v950_v13  ;;  %v979_v18 = vpop.f32.mrb[7].mxu1 }
 0x126   : > { %v980_v19 = vadd.f32 %v979_v18, %v978_v15  ;;  %v696_v20 = vadd.f32 %v977_v14, %v949_v11 }
 0x128   : > { %v699_v21 = vadd.f32 %v980_v19, %v952_v17 }
 0x12a   : > { %v997_v22 = vpop.f32.mrb[8].mxu0 }
 0x12b   : > { %v745_v23 = vadd.f32 %v997_v22, %v696_v20  ;;  %v736_v24 = vpop.f32.mrb[9].mxu0 }
 0x12c   : > { %v737_v25 = vadd.f32 %v736_v24, %v688_v6  ;;  %v998_v26 = vpop.f32.mrb[10].mxu0 }
 0x12d   : > { %v748_v27 = vadd.f32 %v998_v26, %v699_v21  ;;  %v739_v28 = vpop.f32.mrb[11].mxu0 }
 0x12e   : > { %v740_v29 = vadd.f32 %v739_v28, %v691_v7 }
 0x12f   : > { %v752_v30 = vmax.f32 %v745_v23, %v748_v27 }
 0x130   : > { %v751_v31 = vmax.f32 %v737_v25, %v740_v29 }
 0x132   : > { %v753_v33 = vmax.f32 %v751_v31, %v752_v30 }
 0x134   : > { %v761_v34 = vadd.f32 %v922_v32, %v753_v33 }
 0x136   : > { %v762_v35 = vmax.f32 %v761_v34, 0.0 }
 0x138   : > { %v763_v36 = vpack.c.bf16 %v762_v35, %v762_v35 }
 0x13a   : > { %764 = vst [vmem:[%s245_s4] sm:$0xf] %v763_v36 }
 0x13b PF: > { %s13_s18 = sadd.s32 1, %s1163_s18   ;;  %s1403_s12 = smov %s1143_s13 }
 0x13c   : > { %p10_p12 = scmp.ge.s32.totalorder %s13_s18, 6   ;;  %s1404_s13 = smov %s1236_s25 }
 0x13d   : > { %s1405_s14 = smov %s1155_s16  ;;  %s1406_s15 = smov %s1159_s17 }
 0x13e   : > { %s1407_s16 = smov %s1410_s19  ;;  %s1408_s17 = smov %s1414_s20 }
 0x13f   :  { %12 = sbr.rel (!%p10_p12) target bundleno = 4 (0x4), region = 99 }

// kernel: serina_forward.5
= control target key start
LH: loop header
LB: loop body
LE: loop exit
PB: predicated region body
PF: predicated region fallthrough
CT: control target
= control target key end

     0   :  { %10 = vsyncpa [#allocation5], 0  ;;  %s1094_s18 = smov 0   ;;  %s1096_s19 = smov 0   ;;  %s1308_s0 = inlined_call_operand.vmem [shape: bf16[2,2048], index: 0, kind: input, shape index: {}]   ;;  %s1309_s1 = inlined_call_operand.vmem [shape: bf16[64,2048], index: 1, kind: input, shape index: {}]   ;;  %s1310_s2 = inlined_call_operand.vmem [shape: f32[1,64], index: 2, kind: input, shape index: {}]   ;;  %s1311_s3 = inlined_call_operand.vmem [shape: bf16[64,10], index: 3, kind: input, shape index: {}]   ;;  %s1312_s4 = inlined_call_operand.vmem [shape: f32[1,10], index: 4, kind: input, shape index: {}]   ;;  %s1313_s5 = inlined_call_operand.hbm [shape: f32[2,10], index: 5, kind: output, shape index: {}]  }
   0x1   :  { %s1098_s20 = smov 0  }
   0x2 LB: > { %s1110_s21 = sadd.s32 4294967295, %s1058_s20   ;;  %s1113_s22 = sadd.s32 1, %s1058_s20   ;;  %s1058_s20 = sphi %s1098_s20, %s1316_s20   ;;  %s1054_s19 = sphi %s1096_s19, %s1315_s19   ;;  %s1050_s18 = sphi %s1094_s18, %s1314_s18  }
   0x3   : > { %s46_s23 = ssub.s32 %s1058_s20, %s1113_s22  ;;  %s49_s24 = sadd.s32 1, %s1054_s19 }
   0x4   : > { %p47_p0 = scmp.eq.s32.totalorder %s46_s23, 0  ;;  %p56_p1 = scmp.ne.s32.totalorder %s1054_s19, %s1050_s18 }
   0x5   : > { %p57_p2 = scmp.eq.s32.totalorder %s1058_s20, 0  ;;  %p897_p4 = scmp.ge.s32.totalorder %s1058_s20, 2 }
   0x6   : > { %s1122_s25 = scalar_select %p47_p0, %s1054_s19, %s49_s24  }
   0x7   : > { %p58_p3 = por %p57_p2, %p56_p1  ;;  %175 = sbr.rel (%p897_p4) target bundleno = 34 (0x22), region = 28 }
   0xe   : > { %186 = sbr.rel (!%p58_p3) target bundleno = 34 (0x22), region = 36  ;;  %s188_s26 = sand.u32 (%p58_p3), 1, %s1054_s19  }
   0xf   : > { %s949_s27 = sshll.u32 (%p58_p3), %s1058_s20, 5  ;;  %s898_s28 = sshll.u32 (%p58_p3), %s188_s26, 8 }
  0x10   : > { %s1130_s6 = scalar_lea.vmem (%p58_p3), %s1309_s1, %s949_s27  ;;  %s1135_s7 = scalar_lea.vmem (%p58_p3), [#allocation3], %s898_s28 }
  0x11   : > { %v206_v0 = vld [vmem:[%s1130_s6] sm:$0xff] (%p58_p3)  ;;  %v208_v1 = vld [vmem:[%s1130_s6 + $0x8] sm:$0xff] (%p58_p3)  ;;  %v210_v2 = vld [vmem:[%s1130_s6 + $0x10] sm:$0xff] (%p58_p3) }
  0x12   : > { %207 = vst [vmem:[%s1135_s7] sm:$0xff] (%p58_p3), %v206_v0  ;;  %209 = vst [vmem:[%s1135_s7 + $0x8] sm:$0xff] (%p58_p3), %v208_v1  ;;  %v212_v3 = vld [vmem:[%s1130_s6 + $0x18] sm:$0xff] (%p58_p3)  ;;  %v214_v4 = vld [vmem:[%s1130_s6 + $0x40] sm:$0xff] (%p58_p3) }
  0x13   : > { %211 = vst [vmem:[%s1135_s7 + $0x10] sm:$0xff] (%p58_p3), %v210_v2  ;;  %v216_v5 = vld [vmem:[%s1130_s6 + $0x48] sm:$0xff] (%p58_p3)  ;;  %213 = vst [vmem:[%s1135_s7 + $0x18] sm:$0xff] (%p58_p3), %v212_v3  ;;  %v218_v6 = vld [vmem:[%s1130_s6 + $0x50] sm:$0xff] (%p58_p3) }
  0x14   : > { %215 = vst [vmem:[%s1135_s7 + $0x20] sm:$0xff] (%p58_p3), %v214_v4  ;;  %217 = vst [vmem:[%s1135_s7 + $0x28] sm:$0xff] (%p58_p3), %v216_v5  ;;  %v220_v7 = vld [vmem:[%s1130_s6 + $0x58] sm:$0xff] (%p58_p3)  ;;  %v222_v8 = vld [vmem:[%s1130_s6 + $0x80] sm:$0xff] (%p58_p3) }
  0x15   : > { %219 = vst [vmem:[%s1135_s7 + $0x30] sm:$0xff] %v218_v6  ;;  %221 = vst [vmem:[%s1135_s7 + $0x38] sm:$0xff] %v220_v7  ;;  %v224_v9 = vld [vmem:[%s1130_s6 + $0x88] sm:$0xff]  ;;  %v226_v10 = vld [vmem:[%s1130_s6 + $0x90] sm:$0xff] }
  0x16   : > { %223 = vst [vmem:[%s1135_s7 + $0x40] sm:$0xff] %v222_v8  ;;  %v228_v11 = vld [vmem:[%s1130_s6 + $0x98] sm:$0xff]  ;;  %225 = vst [vmem:[%s1135_s7 + $0x48] sm:$0xff] %v224_v9  ;;  %v230_v12 = vld [vmem:[%s1130_s6 + $0xc0] sm:$0xff] }
  0x17   : > { %227 = vst [vmem:[%s1135_s7 + $0x50] sm:$0xff] %v226_v10  ;;  %229 = vst [vmem:[%s1135_s7 + $0x58] sm:$0xff] %v228_v11  ;;  %v232_v13 = vld [vmem:[%s1130_s6 + $0xc8] sm:$0xff]  ;;  %v234_v14 = vld [vmem:[%s1130_s6 + $0xd0] sm:$0xff] }
  0x18   : > { %231 = vst [vmem:[%s1135_s7 + $0x60] sm:$0xff] %v230_v12  ;;  %233 = vst [vmem:[%s1135_s7 + $0x68] sm:$0xff] %v232_v13  ;;  %v236_v15 = vld [vmem:[%s1130_s6 + $0xd8] sm:$0xff]  ;;  %v238_v16 = vld [vmem:[%s1130_s6 + $0x100] sm:$0xff] }
  0x19   : > { %235 = vst [vmem:[%s1135_s7 + $0x70] sm:$0xff] %v234_v14  ;;  %v240_v17 = vld [vmem:[%s1130_s6 + $0x108] sm:$0xff]  ;;  %237 = vst [vmem:[%s1135_s7 + $0x78] sm:$0xff] %v236_v15  ;;  %v242_v18 = vld [vmem:[%s1130_s6 + $0x110] sm:$0xff] }
  0x1a   : > { %239 = vst [vmem:[%s1135_s7 + $0x80] sm:$0xff] %v238_v16  ;;  %241 = vst [vmem:[%s1135_s7 + $0x88] sm:$0xff] %v240_v17  ;;  %v244_v19 = vld [vmem:[%s1130_s6 + $0x118] sm:$0xff]  ;;  %v246_v20 = vld [vmem:[%s1130_s6 + $0x140] sm:$0xff] }
  0x1b   : > { %243 = vst [vmem:[%s1135_s7 + $0x90] sm:$0xff] %v242_v18  ;;  %245 = vst [vmem:[%s1135_s7 + $0x98] sm:$0xff] %v244_v19  ;;  %v248_v21 = vld [vmem:[%s1130_s6 + $0x148] sm:$0xff]  ;;  %v250_v22 = vld [vmem:[%s1130_s6 + $0x150] sm:$0xff] }
  0x1c   : > { %247 = vst [vmem:[%s1135_s7 + $0xa0] sm:$0xff] %v246_v20  ;;  %v252_v23 = vld [vmem:[%s1130_s6 + $0x158] sm:$0xff]  ;;  %249 = vst [vmem:[%s1135_s7 + $0xa8] sm:$0xff] %v248_v21  ;;  %v254_v24 = vld [vmem:[%s1130_s6 + $0x180] sm:$0xff] }
  0x1d   : > { %251 = vst [vmem:[%s1135_s7 + $0xb0] sm:$0xff] %v250_v22  ;;  %253 = vst [vmem:[%s1135_s7 + $0xb8] sm:$0xff] %v252_v23  ;;  %v256_v25 = vld [vmem:[%s1130_s6 + $0x188] sm:$0xff]  ;;  %v258_v26 = vld [vmem:[%s1130_s6 + $0x190] sm:$0xff] }
  0x1e   : > { %255 = vst [vmem:[%s1135_s7 + $0xc0] sm:$0xff] %v254_v24  ;;  %257 = vst [vmem:[%s1135_s7 + $0xc8] sm:$0xff] %v256_v25  ;;  %v260_v27 = vld [vmem:[%s1130_s6 + $0x198] sm:$0xff]  ;;  %v262_v28 = vld [vmem:[%s1130_s6 + $0x1c0] sm:$0xff] }
  0x1f   : > { %259 = vst [vmem:[%s1135_s7 + $0xd0] sm:$0xff] %v258_v26  ;;  %v264_v29 = vld [vmem:[%s1130_s6 + $0x1c8] sm:$0xff]  ;;  %261 = vst [vmem:[%s1135_s7 + $0xd8] sm:$0xff] %v260_v27  ;;  %v266_v30 = vld [vmem:[%s1130_s6 + $0x1d0] sm:$0xff] }
  0x20   : > { %263 = vst [vmem:[%s1135_s7 + $0xe0] sm:$0xff] %v262_v28  ;;  %265 = vst [vmem:[%s1135_s7 + $0xe8] sm:$0xff] %v264_v29  ;;  %v268_v31 = vld [vmem:[%s1130_s6 + $0x1d8] sm:$0xff] }
  0x21   : > { %267 = vst [vmem:[%s1135_s7 + $0xf0] sm:$0xff] %v266_v30  ;;  %269 = vst [vmem:[%s1135_s7 + $0xf8] sm:$0xff] %v268_v31 }
  0x22 PF: > { %p901_p5 = scmp.ge.s32.totalorder %s1058_s20, 1  ;;  %p274_p6 = scmp.lt.s32.totalorder %s1058_s20, 3 }
  0x24   : > { %p275_p7 = pnand %p901_p5, %p274_p6 }
  0x25   : > { %s281_s8 = sand.u32 (!%p275_p7), 1, %s1050_s18   ;;  %s903_s9 = sshll.u32 (!%p275_p7), %s1110_s21, 3 }
  0x26   : > { %278 = sbr.rel (%p275_p7) target bundleno = 590 (0x24e), region = 59  ;;  %s902_s10 = sshll.u32 (!%p275_p7), %s281_s8, 8 }
  0x27   : > { %p308_p8 = scmp.lt.s32.totalorder (!%p275_p7), %s903_s9, 15  ;;  %s1208_s14 = scalar_lea.vmem (!%p275_p7), [#allocation3], %s902_s10 }
  0x28   : > { %p904_p9 = scmp.ne.s32.totalorder (!%p275_p7), %s1110_s21, 0 }
  0x2d   : > { %s1318_s9 = smov (!%p308_p8, %s903_s9), 15  ;;  %317 = sbr.rel (%p904_p9) target bundleno = 52 (0x34), region = 67 }
  0x2e   : > { %s310_s13 = scalar_lea.vmem %s1308_s0, %s1318_s9  ;;  %v905_v32 = vld [vmem:[%s1310_s2] ss:$0 sm:$0xff] (!%p904_p9)  ;;  %vm325_vm0 = vcmask (!%p904_p9), 517120  }
  0x2f   : > { %326 = vst.msk [vmem:[#allocation2] sm:$0x3] (!%p904_p9), %vm325_vm0, %v905_v32 }
  0x34 PF: > { %v329_v33 = vld [vmem:[%s1208_s14] sm:$0xff]  ;;  %v330_v35 = vld [vmem:[%s1208_s14 + $0x8] sm:$0xff]  ;;  %v366_v36 = vlaneseq  ;;  %v1060_v42 = vmov 1966171168   ;;  %v331_v11 = vld [vmem:[%s1208_s14 + $0x10] sm:$0xff]  ;;  %vm740_vm1 = vcmask 517120  }
  0x35   : > { %v333_v34 = vld [vmem:[%s1208_s14 + $0x20] sm:$0xff]  ;;  %v334_v38 = vld [vmem:[%s1208_s14 + $0x28] sm:$0xff]  ;;  %v364_v43 = vunpack.c.l.s4 %v1060_v42  ;;  %v335_v12 = vld [vmem:[%s1208_s14 + $0x30] sm:$0xff]  ;;  %p938_p10 = scmp.ne.s32.totalorder %s1110_s21, 1 }
  0x36   : > { %v907_v37 = vcombine.high %v329_v33, %v333_v34  ;;  %v906_v39 = vcombine.low %v329_v33, %v333_v34  ;;  %v337_v40 = vld [vmem:[%s1208_s14 + $0x40] sm:$0xff]  ;;  %v909_v44 = vcombine.high %v330_v35, %v334_v38  ;;  %v908_v45 = vcombine.low %v330_v35, %v334_v38  ;;  %v338_v47 = vld [vmem:[%s1208_s14 + $0x48] sm:$0xff]  ;;  %v332_v13 = vld [vmem:[%s1208_s14 + $0x18] sm:$0xff] }
  0x37   : > { %v341_v41 = vld [vmem:[%s1208_s14 + $0x60] sm:$0xff]  ;;  %v342_v48 = vld [vmem:[%s1208_s14 + $0x68] sm:$0xff]  ;;  %v365_v50 = vunpack.c.0.s8 %v364_v43  ;;  %v367_v51 = vshrl.u32 %v366_v36, 7  ;;  %v336_v14 = vld [vmem:[%s1208_s14 + $0x38] sm:$0xff]  ;;  %v911_v18 = vcombine.high %v331_v11, %v335_v12  ;;  %v910_v28 = vcombine.low %v331_v11, %v335_v12 }
  0x38   : > { %v915_v46 = vcombine.high %v337_v40, %v341_v41  ;;  %579 = vmatprep.subr.bf16.mxu0 %v907_v37  ;;  %v917_v49 = vcombine.high %v338_v47, %v342_v48  ;;  %619 = vmatprep.subr.bf16.mxu1 %v909_v44  ;;  %v328_v52 = vld [vmem:[%s310_s13] sm:$0xff]  ;;  %v346_v56 = vld [vmem:[%s1208_s14 + $0x88] sm:$0xff]  ;;  %v914_v58 = vcombine.low %v337_v40, %v341_v41  ;;  %v339_v22 = vld [vmem:[%s1208_s14 + $0x50] sm:$0xff]  ;;  %v1061_v11 = vmov (!%p938_p10), 0.0  }
  0x39   : > { %580 = vmatpush1.bf16.xpose.msra.mxu0 %v906_v39  ;;  %620 = vmatpush1.bf16.xpose.msra.mxu1 %v908_v45  ;;  %v345_v53 = vld [vmem:[%s1208_s14 + $0x80] sm:$0xff]  ;;  %v1229_v55 = vsub.s32 %v365_v50, %v367_v51  ;;  %v350_v57 = vld [vmem:[%s1208_s14 + $0xa8] sm:$0xff]  ;;  %v916_v60 = vcombine.low %v338_v47, %v342_v48  ;;  %v362_v10 = vcombine.high %v328_v52, %v328_v52  ;;  %v343_v23 = vld [vmem:[%s1208_s14 + $0x70] sm:$0xff]  ;;  %vm1062_vm2 = vmmov (!%p938_p10), 0  }
  0x3a   : > { %581 = vmatprep.subr.bf16.mxu0 %v915_v46  ;;  %621 = vmatprep.subr.bf16.mxu1 %v917_v49  ;;  %v349_v54 = vld [vmem:[%s1208_s14 + $0xa0] sm:$0xff]  ;;  %v925_v62 = vcombine.high %v346_v56, %v350_v57  ;;  %v354_v4 = vld [vmem:[%s1208_s14 + $0xc8] sm:$0xff]  ;;  %v924_v7 = vcombine.low %v346_v56, %v350_v57  ;;  %v913_v19 = vcombine.high %v332_v13, %v336_v14  ;;  %v340_v24 = vld [vmem:[%s1208_s14 + $0x58] sm:$0xff]  ;;  %vm788_vm3 = vcmask (!%p938_p10), 523264  }
  0x3b   : > { %v369_v59 = vrot.slane %v328_v52, %v1229_v55  ;;  %v923_v61 = vcombine.high %v345_v53, %v349_v54  ;;  %v353_v1 = vld [vmem:[%s1208_s14 + $0xc0] sm:$0xff]  ;;  %v358_v5 = vld [vmem:[%s1208_s14 + $0xe8] sm:$0xff]  ;;  %v922_v6 = vcombine.low %v345_v53, %v349_v54  ;;  %v376_v15 = vrot.slane %v362_v10, %v1229_v55  ;;  %v344_v25 = vld [vmem:[%s1208_s14 + $0x78] sm:$0xff] }
  0x3c   : > { %v357_v2 = vld [vmem:[%s1208_s14 + $0xe0] sm:$0xff]  ;;  %v933_v9 = vcombine.high %v354_v4, %v358_v5  ;;  %v932_v17 = vcombine.low %v354_v4, %v358_v5  ;;  %v912_v29 = vcombine.low %v332_v13, %v336_v14  ;;  %v919_v30 = vcombine.high %v339_v22, %v343_v23  ;;  %v347_v33 = vld [vmem:[%s1208_s14 + $0x90] sm:$0xff]  ;;  %v348_v35 = vld [vmem:[%s1208_s14 + $0x98] sm:$0xff] }
  0x3d   : > { %v377_v63 = vcombine.high %v369_v59, %v369_v59  ;;  %v931_v8 = vcombine.high %v353_v1, %v357_v2  ;;  %v930_v16 = vcombine.low %v353_v1, %v357_v2  ;;  %v378_v20 = vcombine.high %v376_v15, %v376_v15  ;;  %v351_v34 = vld [vmem:[%s1208_s14 + $0xb0] sm:$0xff]  ;;  %v352_v36 = vld [vmem:[%s1208_s14 + $0xb8] sm:$0xff]  ;;  %v1003_v12 = vld [vmem:[%s1311_s3 + $0x8] sm:$0xff] (!%p938_p10)  }
  0x3e   : > { %v385_v21 = vrot.slane %v369_v59, %v1229_v55  ;;  %v921_v31 = vcombine.high %v340_v24, %v344_v25  ;;  %v918_v37 = vcombine.low %v339_v22, %v343_v23  ;;  %v920_v38 = vcombine.low %v340_v24, %v344_v25  ;;  %v355_v41 = vld [vmem:[%s1208_s14 + $0xd0] sm:$0xff]  ;;  %v356_v43 = vld [vmem:[%s1208_s14 + $0xd8] sm:$0xff] }
  0x3f   : > { %v399_v0 = vrot.slane %v377_v63, %v1229_v55  ;;  %v406_v26 = vrot.slane %v378_v20, %v1229_v55  ;;  %v927_v39 = vcombine.high %v347_v33, %v351_v34  ;;  %v929_v40 = vcombine.high %v348_v35, %v352_v36  ;;  %v359_v42 = vld [vmem:[%s1208_s14 + $0xf0] sm:$0xff]  ;;  %v360_v44 = vld [vmem:[%s1208_s14 + $0xf8] sm:$0xff] }
  0x40   : > { %v407_v27 = vcombine.high %v385_v21, %v385_v21  ;;  %v926_v45 = vcombine.low %v347_v33, %v351_v34  ;;  %v928_v46 = vcombine.low %v348_v35, %v352_v36  ;;  %v935_v47 = vcombine.high %v355_v41, %v359_v42  ;;  %v1002_v10 = vld [vmem:[%s1311_s3] sm:$0xff] (!%p938_p10)   ;;  %v1004_v13 = vld [vmem:[%s1311_s3 + $0x10] sm:$0xff] (!%p938_p10)  }
  0x41   : > { %582 = vmatpush1.bf16.xpose.msra.mxu0 %v914_v58  ;;  %622 = vmatpush1.bf16.xpose.msra.mxu1 %v916_v60  ;;  %v409_v3 = vcombine.high %v399_v0, %v399_v0  ;;  %v410_v32 = vcombine.high %v406_v26, %v406_v26  ;;  %v937_v48 = vcombine.high %v356_v43, %v360_v44  ;;  %vm832_vm4 = vcmask (!%p938_p10), 74752  }
  0x42   : > { %583 = vmatprep.subr.bf16.mxu0 %v923_v61  ;;  %623 = vmatprep.subr.bf16.mxu1 %v925_v62  ;;  %v934_v49 = vcombine.low %v355_v41, %v359_v42  ;;  %v936_v50 = vcombine.low %v356_v43, %v360_v44  ;;  %v392_v51 = vrot.slane %v376_v15, %v1229_v55 }
  0x43   : > { %611 = vmatprep.mubr.bf16.mxu0 %v399_v0  ;;  %651 = vmatprep.mubr.bf16.mxu1 %v409_v3  ;;  %v327_v3 = vld [vmem:[#allocation2] sm:$0x3] }
  0x44   : > { %v408_v52 = vcombine.high %v392_v51, %v392_v51 }
  0x49   : > { %584 = vmatpush1.bf16.xpose.msra.mxu0 %v922_v6  ;;  %624 = vmatpush1.bf16.xpose.msra.mxu1 %v924_v7 }
  0x4a   : > { %585 = vmatprep.subr.bf16.mxu0 %v931_v8  ;;  %625 = vmatprep.subr.bf16.mxu1 %v933_v9 }
  0x51   : > { %586 = vmatpush1.bf16.xpose.msra.mxu0 %v930_v16  ;;  %626 = vmatpush1.bf16.xpose.msra.mxu1 %v932_v17  ;;  %v1005_v16 = vld [vmem:[%s1311_s3 + $0x18] sm:$0xff] (!%p938_p10)  }
  0x52   : > { %659 = vmatprep.subr.bf16.mxu0 %v911_v18  ;;  %699 = vmatprep.subr.bf16.mxu1 %v913_v19  ;;  %v939_v18 = vld [vmem:[%s1312_s4] ss:$0 sm:$0xff] (!%p938_p10) }
  0x58   : > { %612 = vmatmul.mubr.bf16.vlgmr.msra.gmra.mrb[0].mxu0 %v385_v21  ;;  %652 = vmatmul.mubr.bf16.vlgmr.msra.gmra.mrb[0].mxu1 %v407_v27 }
  0x59   : > { %660 = vmatpush1.bf16.xpose.msra.mxu0 %v910_v28  ;;  %700 = vmatpush1.bf16.xpose.msra.mxu1 %v912_v29 }
  0x5a   : > { %661 = vmatprep.subr.bf16.mxu0 %v919_v30  ;;  %701 = vmatprep.subr.bf16.mxu1 %v921_v31 }
  0x5b   : > { %691 = vmatprep.mubr.bf16.mxu0 %v406_v26  ;;  %731 = vmatprep.mubr.bf16.mxu1 %v410_v32 }
  0x61   : > { %662 = vmatpush1.bf16.xpose.msra.mxu0 %v918_v37  ;;  %702 = vmatpush1.bf16.xpose.msra.mxu1 %v920_v38 }
  0x62   : > { %663 = vmatprep.subr.bf16.mxu0 %v927_v39  ;;  %703 = vmatprep.subr.bf16.mxu1 %v929_v40 }
  0x69   : > { %664 = vmatpush1.bf16.xpose.msra.mxu0 %v926_v45  ;;  %704 = vmatpush1.bf16.xpose.msra.mxu1 %v928_v46 }
  0x6a   : > { %665 = vmatprep.subr.bf16.mxu0 %v935_v47  ;;  %705 = vmatprep.subr.bf16.mxu1 %v937_v48 }
  0x71   : > { %666 = vmatpush1.bf16.xpose.msra.mxu0 %v934_v49  ;;  %706 = vmatpush1.bf16.xpose.msra.mxu1 %v936_v50 }
  0x72   : > { %955 = vmatprep.subr.bf16.mxu0 (!%p938_p10), %v1061_v11 }
  0x78   : > { %692 = vmatmul.mubr.bf16.vlgmr.msra.gmra.mrb[4].mxu0 %v392_v51  ;;  %732 = vmatmul.mubr.bf16.vlgmr.msra.gmra.mrb[4].mxu1 %v408_v52 }
  0x79   : > { %956 = vmatpush3.bf16.msra.mxu0 (!%p938_p10), %v1002_v10  ;;  %963 = vmatprep.mubr.msk.bf16.mxu0 (!%p938_p10), %vm1062_vm2, %v1061_v11 }
  0x7a   : > { %957 = vmatprep.subr.bf16.mxu0 (!%p938_p10), %v1061_v11 }
  0x7d   : > { %958 = vmatpush3.bf16.msra.mxu0 (!%p938_p10), %v1003_v12 }
  0x7e   : > { %959 = vmatprep.subr.bf16.mxu0 (!%p938_p10), %v1061_v11 }
  0x81   : > { %960 = vmatpush3.bf16.msra.mxu0 (!%p938_p10), %v1004_v13 }
  0x82   : > { %961 = vmatprep.subr.bf16.mxu0 (!%p938_p10), %v1061_v11 }
  0x85   : > { %962 = vmatpush3.bf16.msra.mxu0 (!%p938_p10), %v1005_v16 }
 0x12b   : > { %v613_v53 = vpop.f32.mrb[0].mxu0  ;;  %v653_v54 = vpop.f32.mrb[0].mxu1 }
 0x12c   : > { %v615_v56 = vpop.f32.mrb[1].mxu0  ;;  %v654_v57 = vadd.f32 %v653_v54, %v613_v53  ;;  %v655_v58 = vpop.f32.mrb[1].mxu1 }
 0x12d   : > { %v616_v59 = vpop.f32.mrb[2].mxu0  ;;  %v656_v60 = vpop.f32.mrb[2].mxu1 }
 0x12e   : > { %v617_v61 = vpop.f32.mrb[3].mxu0  ;;  %v657_v62 = vpop.f32.mrb[3].mxu1 }
 0x14b   : > { %v693_v63 = vpop.f32.mrb[4].mxu0  ;;  %v733_v1 = vpop.f32.mrb[4].mxu1 }
 0x14c   : > { %v694_v0 = vadd.f32 %v693_v63, %v654_v57  ;;  %v695_v2 = vpop.f32.mrb[5].mxu0  ;;  %v735_v4 = vpop.f32.mrb[5].mxu1  ;;  %745 = sbr.rel (%p938_p10) target bundleno = 565 (0x235), region = 71 }
 0x14d   : > { %v696_v55 = vpop.f32.mrb[6].mxu0  ;;  %v736_v6 = vpop.f32.mrb[6].mxu1 }
 0x14e   : > { %v734_v5 = vadd.f32 %v733_v1, %v694_v0  ;;  %v697_v7 = vpop.f32.mrb[7].mxu0  ;;  %v737_v8 = vpop.f32.mrb[7].mxu1 }
 0x150   : > { %v739_v9 = vadd.f32 %v734_v5, %v327_v3 }
 0x152   : > { %741 = vst.msk [vmem:[#allocation2] sm:$0x3] %vm740_vm1, %v739_v9 }
 0x159   : > { %v746_v14 = vld [vmem:[#allocation2] sm:$0x3] }
 0x15a   : > { %v747_v15 = vmax.f32 %v746_v14, 0.0 }
 0x15c   : > { %v748_v17 = vpack.c.bf16 %v747_v15, %v747_v15 }
 0x15e   : > { %964 = vmatmul.mubr.msk.bf16.vlgmr.msra.gmra.mrb[0].mxu0 %vm788_vm3, %v748_v17 }
 0x231   : > { %v826_v19 = vpop.f32.mrb[0].mxu0 }
 0x232   : > { %v827_v20 = vadd.f32 %v939_v18, %v826_v19  ;;  %v965_v21 = vpop.f32.mrb[1].mxu0 }
 0x233   : > { %v829_v22 = vpop.f32.mrb[2].mxu0 }
 0x234   : > { %833 = vst.msk [vmem:[#allocation4] sm:$0x3] %vm832_vm4, %v827_v20  ;;  %v966_v23 = vpop.f32.mrb[3].mxu0 }
 0x235 PF: > { %p971_p11 = scmp.eq.s32.totalorder %s1110_s21, 1  ;;  %s1063_s8 = smov [#allocation4]  }
 0x236   : > { %s841_s9 = sshll.u32 %s1063_s8, 4  ;;  %s842_s9 = int_to_ptr.vmem [resolvable:$true] %s841_s9 }
 0x237   : > { %s1006_s10 = scalar_lea.vmem %s842_s9, 32  ;;  %p1013_p1 = scmp.lt.s32.totalorder %s842_s9, %s842_s9 }
 0x238   : > { %p1007_p12 = scmp.ne.s32.totalorder %s842_s9, %s1006_s10  ;;  %p1014_p2 = scmp.lt.s32.totalorder %s1006_s10, %s1006_s10 }
 0x23a   : > { %p1008_p13 = pnand %p1007_p12, %p971_p11  ;;  %p1015_p3 = por %p1014_p2, %p1013_p1 }
 0x23c   : > { %p1009_p0 = pneg %p1008_p13 }
 0x23e   : > { %p1016_p4 = pnand %p1015_p3, %p1009_p0 }
 0x240   : > { %1019 = shalt.err (!%p1016_p4)
}
 0x241   : > { %s1020_s13 = scalar_lea.hbm %s1313_s5, 32 }
 0x242   : > { %p1021_p5 = scmp.ne.s32.totalorder %s1313_s5, %s1020_s13  ;;  %p1026_p8 = scmp.lt.u32.totalorder %s1020_s13, %s1313_s5 }
 0x244   : > { %p1022_p6 = pnand %p1021_p5, %p971_p11 }
 0x246   : > { %p1023_p7 = pneg %p1022_p6 }
 0x248   : > { %p1028_p9 = pnand %p1026_p8, %p1023_p7 }
 0x24a   : > { %1031 = shalt.err (!%p1028_p9)
}
 0x24b   : > { %968 = dma.vmem_to_hbm [thread:$0]  (%p971_p11), %s842_s9, 32, %s1313_s5, [#allocation5]  }
 0x24c   : > { %1045 = dma.done.wait (%p971_p11), [#allocation5], 32  }
 0x24d   : > { %1047 = vsyncadd (%p971_p11), [#allocation5], 4294967264 }
 0x24e PF: > { %p13_p10 = scmp.ge.s32.totalorder %s1113_s22, 4   ;;  %s1314_s18 = smov %s1054_s19 }
 0x24f   : > { %s1315_s19 = smov %s1122_s25  ;;  %s1316_s20 = smov %s1113_s22 }
 0x250   :  { %15 = sbr.rel (!%p13_p10) target bundleno = 2 (0x2), region = 106 }
 0x257   :  { %854 = vsyncpa [#allocation5], 1 }
 0x258   :  { %856 = vsyncpa [#allocation5 + $0x1], 1 }

</bundles_post_ra>
